<compile_context>
chip_gen: v6e
topology: v6e:2x2x1
jax: 0.10.0
libtpu: 0.0.40
codegen_flags: <defaults>
</compile_context>

<pallas_src>
import jax
import jax.numpy as jnp
from jax.experimental import pallas as pl
from jax.experimental.pallas import tpu as pltpu


def _round_up(v, m):
    return (v + m - 1) // m * m


def _graphsage_kernel(adj_ref, x_ref, w_ref, b_ref, o_ref):
    # adj_ref: (Bb, Np, Np)      compute dtype (f32 or bf16)
    # x_ref:   (Bb, Np, Fin_p)   compute dtype
    # w_ref:   (Fin_p, Fout_p)   compute dtype (already W^T)
    # b_ref:   (1, Fout_p)       f32
    # o_ref:   (Bb*Np, Fout_p)   f32

    # 1) Per-batch neighbor aggregation on the MXU with f32 accumulation.
    h_agg = jnp.einsum(
        "bij,bjf->bif", adj_ref[...], x_ref[...],
        preferred_element_type=jnp.float32)             # (Bb, Np, Fin_p) f32

    bb, np_, fin_p = h_agg.shape
    # 2) Flatten batch*nodes (tile-aligned: Np, Fin_p multiples of 128) so the
    #    linear layer runs as one MXU matmul with M = Bb*Np >= 128.
    h2 = h_agg.reshape(bb * np_, fin_p).astype(w_ref.dtype)
    h = jnp.dot(h2, w_ref[...], preferred_element_type=jnp.float32)
    h = h + b_ref[...]                                   # (Bb*Np, Fout_p) f32

    # 3) L2 normalize along features: rsqrt on the clamped squared norm
    #    (eps^2 = 1e-24 == clamp_min(1e-12) on the norm -> torch semantics).
    sq = jnp.sum(h * h, axis=-1, keepdims=True)
    h = h * jax.lax.rsqrt(jnp.maximum(sq, 1e-24))

    # 4) ReLU; lane-dense (Fout_p multiple of 128) unmasked store.
    o_ref[...] = jnp.maximum(h, 0.0).astype(o_ref.dtype)


def batched_graphsage(x, adj, w_t, b, *, compute_dtype=jnp.float32,
                      batch_block=None):
    """Forward pass of BatchedGraphSAGE.

    x:   (B, N, Fin)  node features
    adj: (B, N, N)    dense adjacency
    w_t: (Fin, Fout)  W^T of nn.Linear(infeat, outfeat)
    b:   (Fout,)      bias
    compute_dtype: matmul operand dtype. f32 matches the module exactly;
                   bf16 (v6e/v7x) ~doubles MXU throughput and halves adj/x
                   DMA bytes while keeping f32 accumulation.
    """
    B, N, Fin = x.shape
    Fout = w_t.shape[1]

    # Lane-dense / MXU-friendly padded sizes.
    Np = _round_up(N, 128)
    Fin_p = _round_up(Fin, 128)
    Fout_p = _round_up(Fout, 128)

    # Batches per grid step: as many as fit a ~8 MiB block budget (x2 for
    # double-buffering stays well inside the scoped VMEM limit on v5e/v6e/v7x).
    # For the small test shapes this folds ALL batches into a single grid step.
    itemsize = jnp.dtype(compute_dtype).itemsize
    bytes_per_batch = (Np * Np + Np * Fin_p) * itemsize + Np * Fout_p * 4
    if batch_block is None:
        budget = 8 * 1024 * 1024
        batch_block = int(max(1, min(B, budget // max(1, bytes_per_batch))))
    Bb = batch_block
    B_pad = _round_up(B, Bb)
    n_blocks = B_pad // Bb

    # Zero-pad + cast (wrapper-side layout plumbing: padded rows/cols contribute
    # exact zeros to every contraction; padded garbage rows are sliced off).
    cd = compute_dtype
    adj_p = jnp.pad(adj.astype(cd), ((0, B_pad - B), (0, Np - N), (0, Np - N)))
    x_p = jnp.pad(x.astype(cd), ((0, B_pad - B), (0, Np - N), (0, Fin_p - Fin)))
    w_p = jnp.pad(w_t.astype(cd), ((0, Fin_p - Fin), (0, Fout_p - Fout)))
    b_p = jnp.pad(b.astype(jnp.float32), (0, Fout_p - Fout)).reshape(1, Fout_p)

    out = pl.pallas_call(
        _graphsage_kernel,
        out_shape=jax.ShapeDtypeStruct((B_pad * Np, Fout_p), jnp.float32),
        grid_spec=pltpu.PrefetchScalarGridSpec(
            num_scalar_prefetch=0,
            grid=(n_blocks,),
            in_specs=[
                pl.BlockSpec((Bb, Np, Np), lambda i: (i, 0, 0)),     # adj block
                pl.BlockSpec((Bb, Np, Fin_p), lambda i: (i, 0, 0)),  # x block
                pl.BlockSpec((Fin_p, Fout_p), lambda i: (0, 0)),     # W^T (resident)
                pl.BlockSpec((1, Fout_p), lambda i: (0, 0)),         # bias (resident)
            ],
            out_specs=pl.BlockSpec((Bb * Np, Fout_p), lambda i: (i, 0)),
        ),
        compiler_params=pltpu.CompilerParams(
            # Batch-block axis is embarrassingly parallel (megacore/2-TC
            # sharding on v7x once there is more than one block).
            dimension_semantics=("parallel",),
            vmem_limit_bytes=32 * 1024 * 1024,
        ),
    )(adj_p, x_p, w_p, b_p)

    # TODO(synk): for realistic (large-N) graphs add node-row / K tiling with a
    # VMEM f32 accumulator instead of whole-(Np, Np) adjacency blocks.
    return out.reshape(B_pad, Np, Fout_p)[:B, :N, :Fout]


def reference(x, adj, w_t, b):
    h = jnp.einsum("bij,bjf->bif", adj, x)
    h = jnp.einsum("bif,fo->bio", h, w_t) + b
    norm = jnp.sqrt(jnp.sum(h * h, axis=2, keepdims=True))
    h = h / jnp.maximum(norm, 1e-12)
    return jnp.maximum(h, 0.0)


if __name__ == "__main__":
    # Small shapes consistent with the module: batch=2, nodes=16, infeat=32, outfeat=32.
    B, N, FIN, FOUT = 2, 16, 32, 32

    key = jax.random.PRNGKey(0)
    k_x, k_adj, k_w, k_b = jax.random.split(key, 4)

    x = jax.random.normal(k_x, (B, N, FIN), dtype=jnp.float32)
    adj = jax.random.uniform(k_adj, (B, N, N), dtype=jnp.float32)

    # Parameter init mirroring the module: xavier_uniform_ with relu gain,
    # Linear bias default U(-1/sqrt(fan_in), 1/sqrt(fan_in)).
    gain = jnp.sqrt(2.0)
    bound_w = gain * jnp.sqrt(6.0 / (FIN + FOUT))
    W = jax.random.uniform(k_w, (FOUT, FIN), minval=-bound_w, maxval=bound_w,
                           dtype=jnp.float32)
    bound_b = 1.0 / jnp.sqrt(FIN)
    b = jax.random.uniform(k_b, (FOUT,), minval=-bound_b, maxval=bound_b,
                           dtype=jnp.float32)
    w_t = W.T  # (FIN, FOUT) so h @ W^T

    ref = reference(x, adj, w_t, b)

    # f32 path (matches the PyTorch module numerics).
    out = jax.block_until_ready(batched_graphsage(x, adj, w_t, b))
    assert out.shape == (B, N, FOUT)
    assert jnp.allclose(out, ref, atol=1e-5, rtol=1e-5), "f32 mismatch vs reference"

    # bf16-operand path (v6e/v7x throughput option; f32 accumulation).
    out_bf16 = jax.block_until_ready(
        batched_graphsage(x, adj, w_t, b, compute_dtype=jnp.bfloat16))
    assert out_bf16.shape == (B, N, FOUT)
    assert jnp.allclose(out_bf16, ref, atol=5e-2, rtol=5e-2), "bf16 mismatch vs reference"

    print("KERNEL_OK")
</pallas_src>

<mosaic_0001>
module attributes {stable_mosaic.version = 11 : i64} {
  func.func @_graphsage_kernel(%arg0: i32, %arg1: memref<2x128x128xf32, #tpu.memory_space<vmem>>, %arg2: memref<2x128x128xf32, #tpu.memory_space<vmem>>, %arg3: memref<128x128xf32, #tpu.memory_space<vmem>>, %arg4: memref<1x128xf32, #tpu.memory_space<vmem>>, %arg5: memref<256x128xf32, #tpu.memory_space<vmem>>) attributes {dimension_semantics = [#tpu.dimension_semantics<parallel>], iteration_bounds = array<i64: 1>, scalar_prefetch = 0 : i64, scratch_operands = 0 : i64, tpu.core_type = #tpu.core_type<tc>, window_params = [{transform_indices = @transform_0, window_bounds = array<i64: 2, 128, 128>}, {transform_indices = @transform_1, window_bounds = array<i64: 2, 128, 128>}, {pipeline_mode = #tpu.pipeline_mode<synchronous>, transform_indices = @transform_2, window_bounds = array<i64: 128, 128>}, {pipeline_mode = #tpu.pipeline_mode<synchronous>, transform_indices = @transform_3, window_bounds = array<i64: 1, 128>}, {transform_indices = @transform_4, window_bounds = array<i64: 256, 128>}]} {
    %c0 = arith.constant 0 : index
    %c0_0 = arith.constant 0 : index
    %c0_1 = arith.constant 0 : index
    %0 = vector.load %arg1[%c0, %c0_0, %c0_1] : memref<2x128x128xf32, #tpu.memory_space<vmem>>, vector<2x128x128xf32>
    %c0_2 = arith.constant 0 : index
    %c0_3 = arith.constant 0 : index
    %c0_4 = arith.constant 0 : index
    %1 = vector.load %arg2[%c0_2, %c0_3, %c0_4] : memref<2x128x128xf32, #tpu.memory_space<vmem>>, vector<2x128x128xf32>
    "tpu.trace_start"() <{level = 10 : i32, message = "bij,bjf->bif"}> : () -> ()
    %cst = arith.constant dense<0.000000e+00> : vector<2x128x128xf32>
    %2 = tpu.matmul %0, %1, %cst {dimension_numbers = #tpu.dot_dimension_numbers<[2], [1], [1], [2], [0, 0, 0, 1, 1, 2], [0], [0]>} : vector<2x128x128xf32>, vector<2x128x128xf32>, vector<2x128x128xf32> -> vector<2x128x128xf32>
    "tpu.trace_stop"() : () -> ()
    %3 = vector.shape_cast %2 : vector<2x128x128xf32> to vector<256x128xf32>
    %c0_5 = arith.constant 0 : index
    %c0_6 = arith.constant 0 : index
    %4 = vector.load %arg3[%c0_5, %c0_6] : memref<128x128xf32, #tpu.memory_space<vmem>>, vector<128x128xf32>
    %cst_7 = arith.constant dense<0.000000e+00> : vector<256x128xf32>
    %5 = tpu.matmul %3, %4, %cst_7 {dimension_numbers = #tpu.dot_dimension_numbers<[1], [0], [0], [1], [0, 0, 1, 1], [], []>} : vector<256x128xf32>, vector<128x128xf32>, vector<256x128xf32> -> vector<256x128xf32>
    %c0_8 = arith.constant 0 : index
    %c0_9 = arith.constant 0 : index
    %6 = vector.load %arg4[%c0_8, %c0_9] : memref<1x128xf32, #tpu.memory_space<vmem>>, vector<1x128xf32>
    %7 = vector.broadcast %6 : vector<1x128xf32> to vector<256x128xf32>
    %8 = arith.addf %5, %7 : vector<256x128xf32>
    %9 = arith.mulf %8, %8 : vector<256x128xf32>
    %cst_10 = arith.constant dense<0.000000e+00> : vector<256xf32>
    %10 = vector.multi_reduction <add>, %9, %cst_10 [1] : vector<256x128xf32> to vector<256xf32>
    %11 = vector.shape_cast %10 : vector<256xf32> to vector<256x1xf32>
    %cst_11 = arith.constant 1.000000e-24 : f32
    %12 = vector.broadcast %cst_11 : f32 to vector<256x1xf32>
    %13 = arith.maximumf %11, %12 : vector<256x1xf32>
    %14 = math.rsqrt %13 : vector<256x1xf32>
    %15 = vector.broadcast %14 : vector<256x1xf32> to vector<256x128xf32>
    %16 = arith.mulf %8, %15 : vector<256x128xf32>
    %cst_12 = arith.constant 0.000000e+00 : f32
    %17 = vector.broadcast %cst_12 : f32 to vector<256x128xf32>
    %18 = arith.maximumf %16, %17 : vector<256x128xf32>
    %c0_13 = arith.constant 0 : index
    %c0_14 = arith.constant 0 : index
    %19 = vector.load %arg5[%c0_13, %c0_14] : memref<256x128xf32, #tpu.memory_space<vmem>>, vector<256x128xf32>
    tpu.vector_store %arg5[%c0_13, %c0_14], %18 {strides = array<i32>} : memref<256x128xf32, #tpu.memory_space<vmem>>, vector<256x128xf32>,
    return
  }
  func.func @transform_0(%arg0: i32) -> (i32, i32, i32) {
    %c0_i32 = arith.constant 0 : i32
    %c0_i32_0 = arith.constant 0 : i32
    %c0_i32_1 = arith.constant 0 : i32
    return %arg0, %c0_i32, %c0_i32_0 : i32, i32, i32
  }
  func.func @transform_1(%arg0: i32) -> (i32, i32, i32) {
    %c0_i32 = arith.constant 0 : i32
    %c0_i32_0 = arith.constant 0 : i32
    %c0_i32_1 = arith.constant 0 : i32
    return %arg0, %c0_i32, %c0_i32_0 : i32, i32, i32
  }
  func.func @transform_2(%arg0: i32) -> (i32, i32) {
    %c0_i32 = arith.constant 0 : i32
    %c0_i32_0 = arith.constant 0 : i32
    %c0_i32_1 = arith.constant 0 : i32
    return %c0_i32, %c0_i32_0 : i32, i32
  }
  func.func @transform_3(%arg0: i32) -> (i32, i32) {
    %c0_i32 = arith.constant 0 : i32
    %c0_i32_0 = arith.constant 0 : i32
    %c0_i32_1 = arith.constant 0 : i32
    return %c0_i32, %c0_i32_0 : i32, i32
  }
  func.func @transform_4(%arg0: i32) -> (i32, i32) {
    %c0_i32 = arith.constant 0 : i32
    %c0_i32_0 = arith.constant 0 : i32
    return %arg0, %c0_i32 : i32, i32
  }
}

</mosaic_0001>

<bundles_post_ra>
// kernel: tpu_custom_call.1
= control target key start
LH: loop header
LB: loop body
LE: loop exit
PB: predicated region body
PF: predicated region fallthrough
CT: control target
= control target key end

     0   :  { %9 = vsyncpa [#allocation3], 0  ;;  %s1648_s0 = inlined_call_operand.hbm [shape: f32[2,128,128], index: 0, kind: input, shape index: {}]   ;;  %s1649_s1 = inlined_call_operand.hbm [shape: f32[2,128,128], index: 1, kind: input, shape index: {}]   ;;  %s1650_s2 = inlined_call_operand.hbm [shape: f32[128,128], index: 2, kind: input, shape index: {}]   ;;  %s1651_s3 = inlined_call_operand.vmem [shape: f32[1,128], index: 3, kind: input, shape index: {}]   ;;  %s1652_s4 = inlined_call_operand.hbm [shape: f32[256,128], index: 4, kind: output, shape index: {}]  }
   0x1   :  { %10 = vsyncpa [#allocation6], 0 }
   0x2   :  { %11 = vsyncpa [#allocation4], 0  ;;  %s1396_s15 = smov [#allocation5]   ;;  %s1397_s17 = smov [#allocation2]  }
   0x3   :  { %s29_s16 = sshll.u32 %s1396_s15, 4  ;;  %s17_s18 = sshll.u32 %s1397_s17, 4  ;;  %s30_s16 = int_to_ptr.vmem [resolvable:$true] %s29_s16  ;;  %s18_s18 = int_to_ptr.vmem [resolvable:$true] %s17_s18 }
   0x4   :  { %s1318_s19 = scalar_lea.vmem %s30_s16, 4096  ;;  %p1323_p1 = scmp.lt.s32.totalorder %s30_s16, %s30_s16 }
   0x5   :  { %p1319_p0 = scmp.ne.s32.totalorder %s30_s16, %s1318_s19  ;;  %p1324_p2 = scmp.lt.s32.totalorder %s1318_s19, %s1318_s19 }
   0x7   :  { %p1325_p3 = por %p1324_p2, %p1323_p1 }
   0x9   :  { %p1326_p4 = pnand %p1325_p3, %p1319_p0 }
   0xb   :  { %1329 = shalt.err (!%p1326_p4)
}
   0xc   :  { %s1398_s20 = smov 128   ;;  %s1399_s21 = smov 8  }
   0xd   :  { %35 = dma.hbm_to_vmem [thread:$0]  %s1649_s1, 4096, %s30_s16, [#allocation6], %s1398_s20, %s1398_s20, %s1399_s21  }
   0xe   :  { %s1338_s24 = scalar_lea.vmem %s18_s18, 4096  ;;  %p1343_p6 = scmp.lt.s32.totalorder %s18_s18, %s18_s18 }
   0xf   :  { %p1339_p5 = scmp.ne.s32.totalorder %s18_s18, %s1338_s24  ;;  %p1344_p7 = scmp.lt.s32.totalorder %s1338_s24, %s1338_s24 }
  0x11   :  { %p1345_p8 = por %p1344_p7, %p1343_p6 }
  0x13   :  { %p1346_p9 = pnand %p1345_p8, %p1339_p5 }
  0x15   :  { %1349 = shalt.err (!%p1346_p9)
}
  0x16   :  { %23 = dma.hbm_to_vmem [thread:$0]  %s1648_s0, 4096, %s18_s18, [#allocation3], %s1398_s20, %s1398_s20, %s1399_s21  }
  0x17   :  { %s1400_s27 = smov [#allocation7]  }
  0x18   :  { %s41_s28 = sshll.u32 %s1400_s27, 4  ;;  %s42_s28 = int_to_ptr.vmem [resolvable:$true] %s41_s28 }
  0x19   :  { %s1358_s29 = scalar_lea.vmem %s42_s28, 2048  ;;  %p1363_p11 = scmp.lt.s32.totalorder %s42_s28, %s42_s28 }
  0x1a   :  { %p1359_p10 = scmp.ne.s32.totalorder %s42_s28, %s1358_s29  ;;  %p1364_p12 = scmp.lt.s32.totalorder %s1358_s29, %s1358_s29 }
  0x1c   :  { %p1365_p13 = por %p1364_p12, %p1363_p11 }
  0x1e   :  { %p1366_p0 = pnand %p1365_p13, %p1359_p10 }
  0x20   :  { %1369 = shalt.err (!%p1366_p0)
}
  0x21   :  { %47 = dma.hbm_to_vmem [thread:$0]  %s1650_s2, 2048, %s42_s28, [#allocation6], %s1398_s20, %s1398_s20, %s1399_s21  }
  0x22   :  { %1390 = dma.done.wait [#allocation3], 4096  }
  0x23   :  { %1391 = vsyncadd [#allocation3], 4294963200 }
  0x24   :  { %1392 = dma.done.wait [#allocation6], 6144  }
  0x25   :  { %1393 = vsyncadd [#allocation6], 4294961152  ;;  %v106_v0 = vld [vmem:[#allocation5 + $0x78] sm:$0xff]  ;;  %v105_v1 = vld [vmem:[#allocation5 + $0x70] sm:$0xff] }
  0x26   :  { %1048 = vmatprep.subr.mxu1 %v106_v0  ;;  %v104_v2 = vld [vmem:[#allocation5 + $0x68] sm:$0xff]  ;;  %v103_v3 = vld [vmem:[#allocation5 + $0x60] sm:$0xff]  ;;  %v102_v5 = vld [vmem:[#allocation5 + $0x58] sm:$0xff] }
  0x27   :  { %1049 = vmatpush3.msra.mxu1 %v106_v0  ;;  %v59_v4 = vld [vmem:[#allocation2] sm:$0xff]  ;;  %v101_v6 = vld [vmem:[#allocation5 + $0x50] sm:$0xff]  ;;  %v100_v7 = vld [vmem:[#allocation5 + $0x48] sm:$0xff] }
  0x28   :  { %1050 = vmatprep.subr.mxu1 %v105_v1  ;;  %1080 = vmatprep.mubr.f32.mxu1 %v59_v4  ;;  %v99_v8 = vld [vmem:[#allocation5 + $0x40] sm:$0xff]  ;;  %v98_v9 = vld [vmem:[#allocation5 + $0x38] sm:$0xff]  ;;  %v97_v10 = vld [vmem:[#allocation5 + $0x30] sm:$0xff] }
  0x29   :  { %1051 = vmatpush3.msra.mxu1 %v105_v1  ;;  %v96_v11 = vld [vmem:[#allocation5 + $0x28] sm:$0xff]  ;;  %v95_v12 = vld [vmem:[#allocation5 + $0x20] sm:$0xff]  ;;  %v428_v13 = vld [vmem:[#allocation7 + $0x78] sm:$0xff] }
  0x2a   :  { %1052 = vmatprep.subr.mxu1 %v104_v2  ;;  %v427_v14 = vld [vmem:[#allocation7 + $0x70] sm:$0xff]  ;;  %v94_v15 = vld [vmem:[#allocation5 + $0x18] sm:$0xff]  ;;  %1160 = vmatprep.subr.mxu0 %v428_v13  ;;  %v426_v16 = vld [vmem:[#allocation7 + $0x68] sm:$0xff] }
  0x2b   :  { %1053 = vmatpush3.msra.mxu1 %v104_v2  ;;  %1161 = vmatpush3.msra.mxu0 %v428_v13  ;;  %v93_v17 = vld [vmem:[#allocation5 + $0x10] sm:$0xff]  ;;  %v425_v18 = vld [vmem:[#allocation7 + $0x60] sm:$0xff]  ;;  %v92_v19 = vld [vmem:[#allocation5 + $0x8] sm:$0xff] }
  0x2c   :  { %1054 = vmatprep.subr.mxu1 %v103_v3  ;;  %1162 = vmatprep.subr.mxu0 %v427_v14  ;;  %v424_v20 = vld [vmem:[#allocation7 + $0x58] sm:$0xff]  ;;  %v91_v21 = vld [vmem:[#allocation5] sm:$0xff]  ;;  %v423_v22 = vld [vmem:[#allocation7 + $0x50] sm:$0xff] }
  0x2d   :  { %1055 = vmatpush3.msra.mxu1 %v103_v3  ;;  %1163 = vmatpush3.msra.mxu0 %v427_v14  ;;  %v60_v23 = vld [vmem:[#allocation2 + $0x8] sm:$0xff]  ;;  %v122_v24 = vld [vmem:[#allocation5 + $0xf8] sm:$0xff]  ;;  %v61_v25 = vld [vmem:[#allocation2 + $0x10] sm:$0xff] }
  0x2e   :  { %1056 = vmatprep.subr.mxu1 %v102_v5  ;;  %1164 = vmatprep.subr.mxu0 %v426_v16  ;;  %v121_v26 = vld [vmem:[#allocation5 + $0xf0] sm:$0xff]  ;;  %v422_v27 = vld [vmem:[#allocation7 + $0x48] sm:$0xff]  ;;  %v62_v28 = vld [vmem:[#allocation2 + $0x18] sm:$0xff] }
  0x2f   :  { %1057 = vmatpush3.msra.mxu1 %v102_v5  ;;  %1165 = vmatpush3.msra.mxu0 %v426_v16  ;;  %v120_v29 = vld [vmem:[#allocation5 + $0xe8] sm:$0xff]  ;;  %v63_v30 = vld [vmem:[#allocation2 + $0x20] sm:$0xff]  ;;  %v118_v34 = vld [vmem:[#allocation5 + $0xd8] sm:$0xff] }
  0x30   :  { %1058 = vmatprep.subr.mxu1 %v101_v6  ;;  %1166 = vmatprep.subr.mxu0 %v425_v18  ;;  %v119_v31 = vld [vmem:[#allocation5 + $0xe0] sm:$0xff]  ;;  %v64_v33 = vld [vmem:[#allocation2 + $0x28] sm:$0xff]  ;;  %v65_v35 = vld [vmem:[#allocation2 + $0x30] sm:$0xff] }
  0x31   :  { %1059 = vmatpush3.msra.mxu1 %v101_v6  ;;  %1167 = vmatpush3.msra.mxu0 %v425_v18  ;;  %v421_v32 = vld [vmem:[#allocation7 + $0x40] sm:$0xff]  ;;  %v117_v36 = vld [vmem:[#allocation5 + $0xd0] sm:$0xff]  ;;  %v420_v37 = vld [vmem:[#allocation7 + $0x38] sm:$0xff] }
  0x32   :  { %1060 = vmatprep.subr.mxu1 %v100_v7  ;;  %1168 = vmatprep.subr.mxu0 %v424_v20  ;;  %v66_v38 = vld [vmem:[#allocation2 + $0x38] sm:$0xff]  ;;  %v116_v39 = vld [vmem:[#allocation5 + $0xc8] sm:$0xff]  ;;  %v67_v40 = vld [vmem:[#allocation2 + $0x40] sm:$0xff] }
  0x33   :  { %1061 = vmatpush3.msra.mxu1 %v100_v7  ;;  %1169 = vmatpush3.msra.mxu0 %v424_v20  ;;  %v115_v41 = vld [vmem:[#allocation5 + $0xc0] sm:$0xff]  ;;  %v419_v42 = vld [vmem:[#allocation7 + $0x30] sm:$0xff]  ;;  %v68_v43 = vld [vmem:[#allocation2 + $0x48] sm:$0xff] }
  0x34   :  { %1062 = vmatprep.subr.mxu1 %v99_v8  ;;  %1170 = vmatprep.subr.mxu0 %v423_v22  ;;  %v114_v44 = vld [vmem:[#allocation5 + $0xb8] sm:$0xff]  ;;  %v69_v45 = vld [vmem:[#allocation2 + $0x50] sm:$0xff]  ;;  %v418_v47 = vld [vmem:[#allocation7 + $0x28] sm:$0xff] }
  0x35   :  { %1063 = vmatpush3.msra.mxu1 %v99_v8  ;;  %1171 = vmatpush3.msra.mxu0 %v423_v22  ;;  %v113_v46 = vld [vmem:[#allocation5 + $0xb0] sm:$0xff]  ;;  %v70_v48 = vld [vmem:[#allocation2 + $0x58] sm:$0xff]  ;;  %v112_v49 = vld [vmem:[#allocation5 + $0xa8] sm:$0xff] }
  0x36   :  { %1064 = vmatprep.subr.mxu1 %v98_v9  ;;  %1172 = vmatprep.subr.mxu0 %v422_v27  ;;  %v71_v50 = vld [vmem:[#allocation2 + $0x60] sm:$0xff]  ;;  %v72_v53 = vld [vmem:[#allocation2 + $0x68] sm:$0xff]  ;;  %v110_v54 = vld [vmem:[#allocation5 + $0x98] sm:$0xff] }
  0x37   :  { %1065 = vmatpush3.msra.mxu1 %v98_v9  ;;  %1173 = vmatpush3.msra.mxu0 %v422_v27  ;;  %v111_v51 = vld [vmem:[#allocation5 + $0xa0] sm:$0xff]  ;;  %v73_v55 = vld [vmem:[#allocation2 + $0x70] sm:$0xff]  ;;  %v416_v57 = vld [vmem:[#allocation7 + $0x18] sm:$0xff] }
  0x38   :  { %1066 = vmatprep.subr.mxu1 %v97_v10  ;;  %1174 = vmatprep.subr.mxu0 %v421_v32  ;;  %v417_v52 = vld [vmem:[#allocation7 + $0x20] sm:$0xff]  ;;  %v109_v56 = vld [vmem:[#allocation5 + $0x90] sm:$0xff]  ;;  %v74_v58 = vld [vmem:[#allocation2 + $0x78] sm:$0xff] }
  0x39   :  { %1067 = vmatpush3.msra.mxu1 %v97_v10  ;;  %1175 = vmatpush3.msra.mxu0 %v421_v32  ;;  %v108_v59 = vld [vmem:[#allocation5 + $0x88] sm:$0xff]  ;;  %v75_v60 = vld [vmem:[#allocation2 + $0x80] sm:$0xff]  ;;  %v415_v62 = vld [vmem:[#allocation7 + $0x10] sm:$0xff] }
  0x3a   :  { %1068 = vmatprep.subr.mxu1 %v96_v11  ;;  %1176 = vmatprep.subr.mxu0 %v420_v37  ;;  %v107_v61 = vld [vmem:[#allocation5 + $0x80] sm:$0xff]  ;;  %v76_v63 = vld [vmem:[#allocation2 + $0x88] sm:$0xff]  ;;  %v77_v0 = vld [vmem:[#allocation2 + $0x90] sm:$0xff] }
  0x3b   :  { %1069 = vmatpush3.msra.mxu1 %v96_v11  ;;  %1177 = vmatpush3.msra.mxu0 %v420_v37  ;;  %v78_v1 = vld [vmem:[#allocation2 + $0x98] sm:$0xff]  ;;  %v79_v2 = vld [vmem:[#allocation2 + $0xa0] sm:$0xff]  ;;  %v80_v3 = vld [vmem:[#allocation2 + $0xa8] sm:$0xff] }
  0x3c   :  { %1070 = vmatprep.subr.mxu1 %v95_v12  ;;  %1178 = vmatprep.subr.mxu0 %v419_v42  ;;  %v81_v4 = vld [vmem:[#allocation2 + $0xb0] sm:$0xff]  ;;  %v82_v5 = vld [vmem:[#allocation2 + $0xb8] sm:$0xff]  ;;  %v83_v6 = vld [vmem:[#allocation2 + $0xc0] sm:$0xff] }
  0x3d   :  { %1071 = vmatpush3.msra.mxu1 %v95_v12  ;;  %1179 = vmatpush3.msra.mxu0 %v419_v42  ;;  %v84_v7 = vld [vmem:[#allocation2 + $0xc8] sm:$0xff]  ;;  %v85_v8 = vld [vmem:[#allocation2 + $0xd0] sm:$0xff]  ;;  %v86_v9 = vld [vmem:[#allocation2 + $0xd8] sm:$0xff] }
  0x3e   :  { %1072 = vmatprep.subr.mxu1 %v94_v15  ;;  %1180 = vmatprep.subr.mxu0 %v418_v47  ;;  %v87_v10 = vld [vmem:[#allocation2 + $0xe0] sm:$0xff]  ;;  %v88_v11 = vld [vmem:[#allocation2 + $0xe8] sm:$0xff]  ;;  %v89_v12 = vld [vmem:[#allocation2 + $0xf0] sm:$0xff] }
  0x3f   :  { %1073 = vmatpush3.msra.mxu1 %v94_v15  ;;  %1181 = vmatpush3.msra.mxu0 %v418_v47  ;;  %v90_v13 = vld [vmem:[#allocation2 + $0xf8] sm:$0xff]  ;;  %v414_v14 = vld [vmem:[#allocation7 + $0x8] sm:$0xff]  ;;  %v413_v15 = vld [vmem:[#allocation7] sm:$0xff] }
  0x40   :  { %1074 = vmatprep.subr.mxu1 %v93_v17  ;;  %1182 = vmatprep.subr.mxu0 %v417_v52 }
  0x41   :  { %1075 = vmatpush3.msra.mxu1 %v93_v17  ;;  %1183 = vmatpush3.msra.mxu0 %v417_v52 }
  0x42   :  { %1076 = vmatprep.subr.mxu1 %v92_v19  ;;  %1184 = vmatprep.subr.mxu0 %v416_v57 }
  0x43   :  { %1077 = vmatpush3.msra.mxu1 %v92_v19  ;;  %1185 = vmatpush3.msra.mxu0 %v416_v57 }
  0x44   :  { %1078 = vmatprep.subr.mxu1 %v91_v21  ;;  %1186 = vmatprep.subr.mxu0 %v415_v62 }
  0x45   :  { %1079 = vmatpush3.msra.mxu1 %v91_v21  ;;  %1187 = vmatpush3.msra.mxu0 %v415_v62 }
  0x46   :  { %1081 = vmatmul.mubr.f32.vlgmr.msra.gmra.mxu1 %v60_v23  ;;  %1104 = vmatprep.subr.mxu1 %v122_v24 }
  0x47   :  { %1105 = vmatpush3.msra.mxu1 %v122_v24  ;;  %1083 = vmatprep.mubr.f32.mxu1 %v61_v25 }
  0x48   :  { %1106 = vmatprep.subr.mxu1 %v121_v26  ;;  %1188 = vmatprep.subr.mxu0 %v414_v14 }
  0x49   :  { %1107 = vmatpush3.msra.mxu1 %v121_v26  ;;  %1189 = vmatpush3.msra.mxu0 %v414_v14 }
  0x4a   :  { %1084 = vmatmul.mubr.f32.gmra.mxu1 %v62_v28  ;;  %1108 = vmatprep.subr.mxu1 %v120_v29 }
  0x4b   :  { %1109 = vmatpush3.msra.mxu1 %v120_v29  ;;  %1086 = vmatprep.mubr.f32.mxu1 %v63_v30 }
  0x4c   :  { %1110 = vmatprep.subr.mxu1 %v119_v31  ;;  %1190 = vmatprep.subr.mxu0 %v413_v15 }
  0x4d   :  { %1111 = vmatpush3.msra.mxu1 %v119_v31  ;;  %1191 = vmatpush3.msra.mxu0 %v413_v15 }
  0x4e   :  { %1087 = vmatmul.mubr.f32.gmra.mxu1 %v64_v33  ;;  %1112 = vmatprep.subr.mxu1 %v118_v34 }
  0x4f   :  { %1113 = vmatpush3.msra.mxu1 %v118_v34  ;;  %1089 = vmatprep.mubr.f32.mxu1 %v65_v35 }
  0x50   :  { %1114 = vmatprep.subr.mxu1 %v117_v36 }
  0x51   :  { %1115 = vmatpush3.msra.mxu1 %v117_v36 }
  0x52   :  { %1090 = vmatmul.mubr.f32.gmra.mxu1 %v66_v38  ;;  %1116 = vmatprep.subr.mxu1 %v116_v39 }
  0x53   :  { %1117 = vmatpush3.msra.mxu1 %v116_v39  ;;  %1092 = vmatprep.mubr.f32.mxu1 %v67_v40 }
  0x54   :  { %1118 = vmatprep.subr.mxu1 %v115_v41 }
  0x55   :  { %1119 = vmatpush3.msra.mxu1 %v115_v41 }
  0x56   :  { %1093 = vmatmul.mubr.f32.gmra.mxu1 %v68_v43  ;;  %1120 = vmatprep.subr.mxu1 %v114_v44 }
  0x57   :  { %1121 = vmatpush3.msra.mxu1 %v114_v44  ;;  %1095 = vmatprep.mubr.f32.mxu1 %v69_v45 }
  0x58   :  { %1122 = vmatprep.subr.mxu1 %v113_v46 }
  0x59   :  { %1123 = vmatpush3.msra.mxu1 %v113_v46 }
  0x5a   :  { %1096 = vmatmul.mubr.f32.gmra.mxu1 %v70_v48  ;;  %1124 = vmatprep.subr.mxu1 %v112_v49  ;;  %v1448_v48 = vld [vmem:[%s1651_s3] ss:$0 sm:$0xff]  ;;  %s1401_s3 = smov [#allocation8]  }
  0x5b   :  { %1125 = vmatpush3.msra.mxu1 %v112_v49  ;;  %1098 = vmatprep.mubr.f32.mxu1 %v71_v50  ;;  %s922_s5 = sshll.u32 %s1401_s3, 4  ;;  %s923_s5 = int_to_ptr.vmem [resolvable:$true] %s922_s5 }
  0x5c   :  { %1126 = vmatprep.subr.mxu1 %v111_v51  ;;  %s1370_s6 = scalar_lea.vmem %s923_s5, 4096  ;;  %p1375_p2 = scmp.lt.s32.totalorder %s923_s5, %s923_s5 }
  0x5d   :  { %1127 = vmatpush3.msra.mxu1 %v111_v51  ;;  %p1371_p1 = scmp.ne.s32.totalorder %s923_s5, %s1370_s6  ;;  %p1376_p3 = scmp.lt.s32.totalorder %s1370_s6, %s1370_s6 }
  0x5e   :  { %1099 = vmatmul.mubr.f32.gmra.mxu1 %v72_v53  ;;  %1128 = vmatprep.subr.mxu1 %v110_v54 }
  0x5f   :  { %1129 = vmatpush3.msra.mxu1 %v110_v54  ;;  %1101 = vmatprep.mubr.f32.mxu1 %v73_v55  ;;  %p1377_p4 = por %p1376_p3, %p1375_p2 }
  0x60   :  { %1130 = vmatprep.subr.mxu1 %v109_v56 }
  0x61   :  { %1131 = vmatpush3.msra.mxu1 %v109_v56  ;;  %p1378_p5 = pnand %p1377_p4, %p1371_p1 }
  0x62   :  { %1102 = vmatmul.mubr.f32.gmra.mxu1 %v74_v58  ;;  %1132 = vmatprep.subr.mxu1 %v108_v59 }
  0x63   :  { %1133 = vmatpush3.msra.mxu1 %v108_v59  ;;  %1136 = vmatprep.mubr.f32.mxu1 %v75_v60 }
  0x64   :  { %1134 = vmatprep.subr.mxu1 %v107_v61 }
  0x65   :  { %1135 = vmatpush3.msra.mxu1 %v107_v61 }
  0x66   :  { %1137 = vmatmul.mubr.f32.vlgmr.msra.gmra.mxu1 %v76_v63 }
  0x67   :  { %1139 = vmatprep.mubr.f32.mxu1 %v77_v0 }
  0x6a   :  { %1140 = vmatmul.mubr.f32.gmra.mxu1 %v78_v1 }
  0x6b   :  { %1142 = vmatprep.mubr.f32.mxu1 %v79_v2 }
  0x6e   :  { %1143 = vmatmul.mubr.f32.gmra.mxu1 %v80_v3 }
  0x6f   :  { %1145 = vmatprep.mubr.f32.mxu1 %v81_v4 }
  0x72   :  { %1146 = vmatmul.mubr.f32.gmra.mxu1 %v82_v5 }
  0x73   :  { %1148 = vmatprep.mubr.f32.mxu1 %v83_v6 }
  0x76   :  { %1149 = vmatmul.mubr.f32.gmra.mxu1 %v84_v7 }
  0x77   :  { %1151 = vmatprep.mubr.f32.mxu1 %v85_v8 }
  0x7a   :  { %1152 = vmatmul.mubr.f32.gmra.mxu1 %v86_v9 }
  0x7b   :  { %1154 = vmatprep.mubr.f32.mxu1 %v87_v10 }
  0x7e   :  { %1155 = vmatmul.mubr.f32.gmra.mxu1 %v88_v11 }
  0x7f   :  { %1157 = vmatprep.mubr.f32.mxu1 %v89_v12 }
  0x82   :  { %1158 = vmatmul.mubr.f32.gmra.mxu1 %v90_v13 }
 0x106   :  { %v1082_v16 = vpop.f32.mrf.mxu1 }
 0x108   :  { %v189_v17 = vpop.f32.mrf.mxu1 }
 0x109   :  { %1192 = vmatprep.mubr.f32.mxu0 %v189_v17 }
 0x10a   :  { %v1085_v18 = vpop.f32.mrf.mxu1  ;;  %1193 = vmatmul.mubr.f32.vlgmr.msra.gmra.mxu0 %v1082_v16 }
 0x10c   :  { %v199_v19 = vpop.f32.mrf.mxu1 }
 0x10d   :  { %1195 = vmatprep.mubr.f32.mxu0 %v199_v19 }
 0x10e   :  { %v1088_v20 = vpop.f32.mrf.mxu1  ;;  %1196 = vmatmul.mubr.f32.gmra.mxu0 %v1085_v18 }
 0x110   :  { %v209_v21 = vpop.f32.mrf.mxu1 }
 0x111   :  { %1198 = vmatprep.mubr.f32.mxu0 %v209_v21 }
 0x112   :  { %v1091_v22 = vpop.f32.mrf.mxu1  ;;  %1199 = vmatmul.mubr.f32.gmra.mxu0 %v1088_v20 }
 0x114   :  { %v219_v23 = vpop.f32.mrf.mxu1 }
 0x115   :  { %1201 = vmatprep.mubr.f32.mxu0 %v219_v23 }
 0x116   :  { %v1094_v24 = vpop.f32.mrf.mxu1  ;;  %1202 = vmatmul.mubr.f32.gmra.mxu0 %v1091_v22 }
 0x118   :  { %v229_v25 = vpop.f32.mrf.mxu1 }
 0x119   :  { %1204 = vmatprep.mubr.f32.mxu0 %v229_v25 }
 0x11a   :  { %v1097_v26 = vpop.f32.mrf.mxu1  ;;  %1205 = vmatmul.mubr.f32.gmra.mxu0 %v1094_v24 }
 0x11c   :  { %v239_v27 = vpop.f32.mrf.mxu1 }
 0x11d   :  { %1207 = vmatprep.mubr.f32.mxu0 %v239_v27 }
 0x11e   :  { %v1100_v28 = vpop.f32.mrf.mxu1  ;;  %1208 = vmatmul.mubr.f32.gmra.mxu0 %v1097_v26 }
 0x120   :  { %v249_v29 = vpop.f32.mrf.mxu1 }
 0x121   :  { %1210 = vmatprep.mubr.f32.mxu0 %v249_v29 }
 0x122   :  { %v1103_v30 = vpop.f32.mrf.mxu1  ;;  %1211 = vmatmul.mubr.f32.gmra.mxu0 %v1100_v28 }
 0x124   :  { %v259_v31 = vpop.f32.mrf.mxu1 }
 0x125   :  { %1213 = vmatprep.mubr.f32.mxu0 %v259_v31 }
 0x126   :  { %v1138_v32 = vpop.f32.mrf.mxu1  ;;  %1214 = vmatmul.mubr.f32.gmra.mxu0 %v1103_v30 }
 0x128   :  { %v334_v33 = vpop.f32.mrf.mxu1 }
 0x129   :  { %1216 = vmatprep.mubr.f32.mxu0 %v334_v33 }
 0x12a   :  { %v1141_v34 = vpop.f32.mrf.mxu1  ;;  %1217 = vmatmul.mubr.f32.gmra.mxu0 %v1138_v32 }
 0x12c   :  { %v344_v35 = vpop.f32.mrf.mxu1 }
 0x12d   :  { %1219 = vmatprep.mubr.f32.mxu0 %v344_v35 }
 0x12e   :  { %v1144_v36 = vpop.f32.mrf.mxu1  ;;  %1220 = vmatmul.mubr.f32.gmra.mxu0 %v1141_v34 }
 0x130   :  { %v354_v37 = vpop.f32.mrf.mxu1 }
 0x131   :  { %1222 = vmatprep.mubr.f32.mxu0 %v354_v37 }
 0x132   :  { %v1147_v38 = vpop.f32.mrf.mxu1  ;;  %1223 = vmatmul.mubr.f32.gmra.mxu0 %v1144_v36 }
 0x134   :  { %v364_v39 = vpop.f32.mrf.mxu1 }
 0x135   :  { %1225 = vmatprep.mubr.f32.mxu0 %v364_v39 }
 0x136   :  { %v1150_v40 = vpop.f32.mrf.mxu1  ;;  %1226 = vmatmul.mubr.f32.gmra.mxu0 %v1147_v38 }
 0x138   :  { %v374_v41 = vpop.f32.mrf.mxu1 }
 0x139   :  { %1228 = vmatprep.mubr.f32.mxu0 %v374_v41 }
 0x13a   :  { %v1153_v42 = vpop.f32.mrf.mxu1  ;;  %1229 = vmatmul.mubr.f32.gmra.mxu0 %v1150_v40 }
 0x13c   :  { %v384_v43 = vpop.f32.mrf.mxu1 }
 0x13d   :  { %1231 = vmatprep.mubr.f32.mxu0 %v384_v43 }
 0x13e   :  { %v1156_v44 = vpop.f32.mrf.mxu1  ;;  %1232 = vmatmul.mubr.f32.gmra.mxu0 %v1153_v42 }
 0x140   :  { %v394_v45 = vpop.f32.mrf.mxu1 }
 0x141   :  { %1234 = vmatprep.mubr.f32.mxu0 %v394_v45 }
 0x142   :  { %v1159_v46 = vpop.f32.mrf.mxu1  ;;  %1235 = vmatmul.mubr.f32.gmra.mxu0 %v1156_v44 }
 0x144   :  { %v404_v47 = vpop.f32.mrf.mxu1 }
 0x145   :  { %1237 = vmatprep.mubr.f32.mxu0 %v404_v47 }
 0x146   :  { %1238 = vmatmul.mubr.f32.gmra.mxu0 %v1159_v46 }
 0x1ca   :  { %v1194_v49 = vpop.f32.mrf.mxu0 }
 0x1cb   :  { %v1451_v50 = vadd.f32 %v1194_v49, %v1448_v48 }
 0x1cc   :  { %v502_v51 = vpop.f32.mrf.mxu0 }
 0x1cd   :  { %v1454_v52 = vadd.f32 %v1448_v48, %v502_v51  ;;  %v662_v53 = vmul.f32 %v1451_v50, %v1451_v50 }
 0x1ce   :  { %v1197_v54 = vpop.f32.mrf.mxu0 }
 0x1cf   :  { %v1459_v55 = vadd.f32 %v1197_v54, %v1448_v48  ;;  %695 = vadd.xlane.f32.xlu0 %v662_v53  ;;  %v661_v58 = vmul.f32 %v1454_v52, %v1454_v52 }
 0x1d0   :  { %v512_v56 = vpop.f32.mrf.mxu0 }
 0x1d1   :  { %v1462_v57 = vadd.f32 %v1448_v48, %v512_v56  ;;  %v664_v59 = vmul.f32 %v1459_v55, %v1459_v55 }
 0x1d2   :  { %v1200_v60 = vpop.f32.mrf.mxu0 }
 0x1d3   :  { %693 = vadd.xlane.f32.xlu0 %v661_v58  ;;  %699 = vadd.xlane.f32.xlu1 %v664_v59  ;;  %v1469_v62 = vadd.f32 %v1200_v60, %v1448_v48  ;;  %v663_v0 = vmul.f32 %v1462_v57, %v1462_v57 }
 0x1d4   :  { %v522_v61 = vpop.f32.mrf.mxu0 }
 0x1d5   :  { %v1472_v63 = vadd.f32 %v1448_v48, %v522_v61  ;;  %v666_v6 = vmul.f32 %v1469_v62, %v1469_v62 }
 0x1d6   :  { %v1203_v1 = vpop.f32.mrf.mxu0 }
 0x1d7   :  { %697 = vadd.xlane.f32.xlu1 %v663_v0  ;;  %v665_v2 = vmul.f32 %v1472_v63, %v1472_v63  ;;  %v1479_v4 = vadd.f32 %v1203_v1, %v1448_v48 }
 0x1d8   :  { %v532_v3 = vpop.f32.mrf.mxu0 }
 0x1d9   :  { %v1482_v5 = vadd.f32 %v1448_v48, %v532_v3  ;;  %701 = vadd.xlane.f32.xlu0 %v665_v2  ;;  %v668_v12 = vmul.f32 %v1479_v4, %v1479_v4 }
 0x1da   :  { %v1206_v7 = vpop.f32.mrf.mxu0 }
 0x1db   :  { %703 = vadd.xlane.f32.xlu1 %v666_v6  ;;  %v667_v8 = vmul.f32 %v1482_v5, %v1482_v5  ;;  %v1489_v10 = vadd.f32 %v1206_v7, %v1448_v48 }
 0x1dc   :  { %v542_v9 = vpop.f32.mrf.mxu0 }
 0x1dd   :  { %v1492_v11 = vadd.f32 %v1448_v48, %v542_v9  ;;  %705 = vadd.xlane.f32.xlu0 %v667_v8  ;;  %v670_v18 = vmul.f32 %v1489_v10, %v1489_v10 }
 0x1de   :  { %v1209_v13 = vpop.f32.mrf.mxu0 }
 0x1df   :  { %707 = vadd.xlane.f32.xlu1 %v668_v12  ;;  %v669_v14 = vmul.f32 %v1492_v11, %v1492_v11  ;;  %v1499_v16 = vadd.f32 %v1209_v13, %v1448_v48 }
 0x1e0   :  { %v552_v15 = vpop.f32.mrf.mxu0 }
 0x1e1   :  { %v1502_v17 = vadd.f32 %v1448_v48, %v552_v15  ;;  %709 = vadd.xlane.f32.xlu0 %v669_v14  ;;  %v672_v24 = vmul.f32 %v1499_v16, %v1499_v16 }
 0x1e2   :  { %v1212_v19 = vpop.f32.mrf.mxu0 }
 0x1e3   :  { %711 = vadd.xlane.f32.xlu1 %v670_v18  ;;  %v671_v20 = vmul.f32 %v1502_v17, %v1502_v17  ;;  %v1509_v22 = vadd.f32 %v1212_v19, %v1448_v48 }
 0x1e4   :  { %v562_v21 = vpop.f32.mrf.mxu0 }
 0x1e5   :  { %v1512_v23 = vadd.f32 %v1448_v48, %v562_v21  ;;  %713 = vadd.xlane.f32.xlu0 %v671_v20  ;;  %v674_v30 = vmul.f32 %v1509_v22, %v1509_v22 }
 0x1e6   :  { %v1215_v25 = vpop.f32.mrf.mxu0 }
 0x1e7   :  { %715 = vadd.xlane.f32.xlu1 %v672_v24  ;;  %v673_v26 = vmul.f32 %v1512_v23, %v1512_v23  ;;  %v1519_v28 = vadd.f32 %v1215_v25, %v1448_v48 }
 0x1e8   :  { %v572_v27 = vpop.f32.mrf.mxu0 }
 0x1e9   :  { %v1522_v29 = vadd.f32 %v1448_v48, %v572_v27  ;;  %717 = vadd.xlane.f32.xlu0 %v673_v26  ;;  %v676_v36 = vmul.f32 %v1519_v28, %v1519_v28 }
 0x1ea   :  { %v1218_v31 = vpop.f32.mrf.mxu0 }
 0x1eb   :  { %719 = vadd.xlane.f32.xlu1 %v674_v30  ;;  %v675_v32 = vmul.f32 %v1522_v29, %v1522_v29  ;;  %v1529_v34 = vadd.f32 %v1218_v31, %v1448_v48 }
 0x1ec   :  { %v582_v33 = vpop.f32.mrf.mxu0 }
 0x1ed   :  { %v1532_v35 = vadd.f32 %v1448_v48, %v582_v33  ;;  %721 = vadd.xlane.f32.xlu0 %v675_v32  ;;  %v678_v42 = vmul.f32 %v1529_v34, %v1529_v34 }
 0x1ee   :  { %v1221_v37 = vpop.f32.mrf.mxu0 }
 0x1ef   :  { %723 = vadd.xlane.f32.xlu1 %v676_v36  ;;  %v677_v38 = vmul.f32 %v1532_v35, %v1532_v35  ;;  %v1539_v40 = vadd.f32 %v1221_v37, %v1448_v48 }
 0x1f0   :  { %v592_v39 = vpop.f32.mrf.mxu0 }
 0x1f1   :  { %v1542_v41 = vadd.f32 %v1448_v48, %v592_v39  ;;  %725 = vadd.xlane.f32.xlu0 %v677_v38  ;;  %v680_v49 = vmul.f32 %v1539_v40, %v1539_v40 }
 0x1f2   :  { %v1224_v43 = vpop.f32.mrf.mxu0 }
 0x1f3   :  { %727 = vadd.xlane.f32.xlu1 %v678_v42  ;;  %v679_v44 = vmul.f32 %v1542_v41, %v1542_v41  ;;  %v1549_v46 = vadd.f32 %v1224_v43, %v1448_v48 }
 0x1f4   :  { %v602_v45 = vpop.f32.mrf.mxu0 }
 0x1f5   :  { %v1552_v47 = vadd.f32 %v1448_v48, %v602_v45  ;;  %729 = vadd.xlane.f32.xlu0 %v679_v44  ;;  %v682_v59 = vmul.f32 %v1549_v46, %v1549_v46 }
 0x1f6   :  { %v1227_v51 = vpop.f32.mrf.mxu0 }
 0x1f7   :  { %731 = vadd.xlane.f32.xlu1 %v680_v49  ;;  %v681_v53 = vmul.f32 %v1552_v47, %v1552_v47  ;;  %v1559_v56 = vadd.f32 %v1227_v51, %v1448_v48 }
 0x1f8   :  { %v612_v54 = vpop.f32.mrf.mxu0 }
 0x1f9   :  { %v1562_v58 = vadd.f32 %v1448_v48, %v612_v54  ;;  %733 = vadd.xlane.f32.xlu0 %v681_v53  ;;  %v684_v3 = vmul.f32 %v1559_v56, %v1559_v56 }
 0x1fa   :  { %v1230_v60 = vpop.f32.mrf.mxu0 }
 0x1fb   :  { %735 = vadd.xlane.f32.xlu1 %v682_v59  ;;  %v683_v61 = vmul.f32 %v1562_v58, %v1562_v58  ;;  %v1569_v1 = vadd.f32 %v1230_v60, %v1448_v48 }
 0x1fc   :  { %v622_v0 = vpop.f32.mrf.mxu0 }
 0x1fd   :  { %v1572_v2 = vadd.f32 %v1448_v48, %v622_v0  ;;  %737 = vadd.xlane.f32.xlu0 %v683_v61  ;;  %v686_v13 = vmul.f32 %v1569_v1, %v1569_v1 }
 0x1fe   :  { %v1233_v6 = vpop.f32.mrf.mxu0 }
 0x1ff   :  { %739 = vadd.xlane.f32.xlu1 %v684_v3  ;;  %v685_v7 = vmul.f32 %v1572_v2, %v1572_v2  ;;  %v1579_v9 = vadd.f32 %v1233_v6, %v1448_v48 }
 0x200   :  { %v632_v8 = vpop.f32.mrf.mxu0 }
 0x201   :  { %v1582_v12 = vadd.f32 %v1448_v48, %v632_v8  ;;  %741 = vadd.xlane.f32.xlu0 %v685_v7  ;;  %v688_v21 = vmul.f32 %v1579_v9, %v1579_v9 }
 0x202   :  { %v1236_v14 = vpop.f32.mrf.mxu0 }
 0x203   :  { %743 = vadd.xlane.f32.xlu1 %v686_v13  ;;  %v687_v15 = vmul.f32 %v1582_v12, %v1582_v12  ;;  %v1589_v19 = vadd.f32 %v1236_v14, %v1448_v48 }
 0x204   :  { %v642_v18 = vpop.f32.mrf.mxu0 }
 0x205   :  { %v1592_v20 = vadd.f32 %v1448_v48, %v642_v18  ;;  %745 = vadd.xlane.f32.xlu0 %v687_v15  ;;  %v690_v31 = vmul.f32 %v1589_v19, %v1589_v19 }
 0x206   :  { %v1239_v24 = vpop.f32.mrf.mxu0 }
 0x207   :  { %747 = vadd.xlane.f32.xlu1 %v688_v21  ;;  %v689_v25 = vmul.f32 %v1592_v20, %v1592_v20  ;;  %v1599_v27 = vadd.f32 %v1239_v24, %v1448_v48 }
 0x208   :  { %v652_v26 = vpop.f32.mrf.mxu0 }
 0x209   :  { %v1602_v30 = vadd.f32 %v1448_v48, %v652_v26  ;;  %749 = vadd.xlane.f32.xlu0 %v689_v25  ;;  %v692_v33 = vmul.f32 %v1599_v27, %v1599_v27 }
 0x20b   :  { %751 = vadd.xlane.f32.xlu1 %v690_v31  ;;  %v691_v32 = vmul.f32 %v1602_v30, %v1602_v30 }
 0x20d   :  { %753 = vadd.xlane.f32.xlu0 %v691_v32 }
 0x20f   :  { %755 = vadd.xlane.f32.xlu1 %v692_v33 }
 0x258   :  { %v696_v36 = vpop.xlane.xlu0 %695 }
 0x259   :  { %v758_v37 = vmax.f32 %v696_v36, 1e-24 }
 0x25b   :  { %1246 = vrsqrt.f32 %v758_v37 }
 0x25c   :  { %v694_v38 = vpop.xlane.xlu0 %693  ;;  %v700_v39 = vpop.xlane.xlu1 %699 }
 0x25d   :  { %v757_v48 = vmax.f32 %v694_v38, 1e-24  ;;  %v760_v42 = vmax.f32 %v700_v39, 1e-24 }
 0x25f   :  { %1248 = vrsqrt.f32 %v757_v48 }
 0x260   :  { %1250 = vrsqrt.f32 %v760_v42  ;;  %v698_v43 = vpop.xlane.xlu1 %697 }
 0x261   :  { %v759_v44 = vmax.f32 %v698_v43, 1e-24 }
 0x262   :  { %v702_v45 = vpop.xlane.xlu0 %701 }
 0x263   :  { %1252 = vrsqrt.f32 %v759_v44  ;;  %v761_v49 = vmax.f32 %v702_v45, 1e-24 }
 0x264   :  { %v704_v51 = vpop.xlane.xlu1 %703 }
 0x265   :  { %1254 = vrsqrt.f32 %v761_v49  ;;  %v762_v53 = vmax.f32 %v704_v51, 1e-24 }
 0x266   :  { %v706_v54 = vpop.xlane.xlu0 %705 }
 0x267   :  { %1256 = vrsqrt.f32 %v762_v53  ;;  %v763_v59 = vmax.f32 %v706_v54, 1e-24 }
 0x268   :  { %v1247_v60 = vpop.eup %1246  ;;  %v708_v61 = vpop.xlane.xlu1 %707 }
 0x269   :  { %v822_v0 = vmul.f32 %v1247_v60, %v1451_v50  ;;  %1258 = vrsqrt.f32 %v763_v59  ;;  %v764_v3 = vmax.f32 %v708_v61, 1e-24 }
 0x26a   :  { %v710_v6 = vpop.xlane.xlu0 %709 }
 0x26b   :  { %v854_v7 = vmax.f32 %v822_v0, 0.0  ;;  %1260 = vrsqrt.f32 %v764_v3  ;;  %v765_v8 = vmax.f32 %v710_v6, 1e-24 }
 0x26c   :  { %v1249_v13 = vpop.eup %1248  ;;  %v712_v14 = vpop.xlane.xlu1 %711 }
 0x26d   :  { %v1251_v15 = vpop.eup %1250  ;;  %886 = vst [vmem:[#allocation8 + $0x8] sm:$0xff] %v854_v7  ;;  %v821_v18 = vmul.f32 %v1249_v13, %v1454_v52  ;;  %1262 = vrsqrt.f32 %v765_v8  ;;  %v766_v21 = vmax.f32 %v712_v14, 1e-24 }
 0x26e   :  { %v824_v24 = vmul.f32 %v1251_v15, %v1459_v55  ;;  %v714_v25 = vpop.xlane.xlu0 %713 }
 0x26f   :  { %v853_v26 = vmax.f32 %v821_v18, 0.0  ;;  %1264 = vrsqrt.f32 %v766_v21  ;;  %v767_v50 = vmax.f32 %v714_v25, 1e-24 }
 0x270   :  { %v1253_v31 = vpop.eup %1252  ;;  %v856_v32 = vmax.f32 %v824_v24, 0.0  ;;  %v716_v33 = vpop.xlane.xlu1 %715 }
 0x271   :  { %885 = vst [vmem:[#allocation8] sm:$0xff] %v853_v26  ;;  %v823_v36 = vmul.f32 %v1253_v31, %v1462_v57  ;;  %1266 = vrsqrt.f32 %v767_v50  ;;  %v768_v37 = vmax.f32 %v716_v33, 1e-24 }
 0x272   :  { %v1255_v38 = vpop.eup %1254  ;;  %888 = vst [vmem:[#allocation8 + $0x18] sm:$0xff] %v856_v32  ;;  %v718_v39 = vpop.xlane.xlu0 %717 }
 0x273   :  { %v855_v52 = vmax.f32 %v823_v36, 0.0  ;;  %v825_v48 = vmul.f32 %v1255_v38, %v1472_v63  ;;  %1268 = vrsqrt.f32 %v768_v37  ;;  %v769_v55 = vmax.f32 %v718_v39, 1e-24 }
 0x274   :  { %v1257_v42 = vpop.eup %1256  ;;  %v720_v43 = vpop.xlane.xlu1 %719 }
 0x275   :  { %887 = vst [vmem:[#allocation8 + $0x10] sm:$0xff] %v855_v52  ;;  %v857_v44 = vmax.f32 %v825_v48, 0.0  ;;  %v826_v45 = vmul.f32 %v1257_v42, %v1469_v62  ;;  %1270 = vrsqrt.f32 %v769_v55  ;;  %v770_v49 = vmax.f32 %v720_v43, 1e-24 }
 0x276   :  { %v1259_v51 = vpop.eup %1258  ;;  %v722_v57 = vpop.xlane.xlu0 %721 }
 0x277   :  { %889 = vst [vmem:[#allocation8 + $0x20] sm:$0xff] %v857_v44  ;;  %v858_v53 = vmax.f32 %v826_v45, 0.0  ;;  %v827_v54 = vmul.f32 %v1259_v51, %v1482_v5  ;;  %1272 = vrsqrt.f32 %v770_v49  ;;  %v771_v59 = vmax.f32 %v722_v57, 1e-24 }
 0x278   :  { %v1261_v60 = vpop.eup %1260  ;;  %v724_v63 = vpop.xlane.xlu1 %723 }
 0x279   :  { %890 = vst [vmem:[#allocation8 + $0x28] sm:$0xff] %v858_v53  ;;  %v859_v61 = vmax.f32 %v827_v54, 0.0  ;;  %v828_v0 = vmul.f32 %v1261_v60, %v1479_v4  ;;  %1274 = vrsqrt.f32 %v771_v59  ;;  %v772_v3 = vmax.f32 %v724_v63, 1e-24 }
 0x27a   :  { %v1263_v6 = vpop.eup %1262  ;;  %v726_v62 = vpop.xlane.xlu0 %725 }
 0x27b   :  { %891 = vst [vmem:[#allocation8 + $0x30] sm:$0xff] %v859_v61  ;;  %v860_v7 = vmax.f32 %v828_v0, 0.0  ;;  %v829_v8 = vmul.f32 %v1263_v6, %v1492_v11  ;;  %1276 = vrsqrt.f32 %v772_v3  ;;  %v773_v13 = vmax.f32 %v726_v62, 1e-24 }
 0x27c   :  { %v1265_v14 = vpop.eup %1264  ;;  %v728_v5 = vpop.xlane.xlu1 %727 }
 0x27d   :  { %892 = vst [vmem:[#allocation8 + $0x38] sm:$0xff] %v860_v7  ;;  %v861_v15 = vmax.f32 %v829_v8, 0.0  ;;  %v830_v18 = vmul.f32 %v1265_v14, %v1489_v10  ;;  %1278 = vrsqrt.f32 %v773_v13  ;;  %v774_v21 = vmax.f32 %v728_v5, 1e-24 }
 0x27e   :  { %v1267_v24 = vpop.eup %1266  ;;  %v730_v4 = vpop.xlane.xlu0 %729 }
 0x27f   :  { %893 = vst [vmem:[#allocation8 + $0x40] sm:$0xff] %v861_v15  ;;  %v862_v25 = vmax.f32 %v830_v18, 0.0  ;;  %v831_v26 = vmul.f32 %v1267_v24, %v1502_v17  ;;  %1280 = vrsqrt.f32 %v774_v21  ;;  %v775_v50 = vmax.f32 %v730_v4, 1e-24 }
 0x280   :  { %v1269_v31 = vpop.eup %1268  ;;  %v732_v11 = vpop.xlane.xlu1 %731 }
 0x281   :  { %894 = vst [vmem:[#allocation8 + $0x48] sm:$0xff] %v862_v25  ;;  %v863_v32 = vmax.f32 %v831_v26, 0.0  ;;  %v832_v33 = vmul.f32 %v1269_v31, %v1499_v16  ;;  %1282 = vrsqrt.f32 %v775_v50  ;;  %v776_v36 = vmax.f32 %v732_v11, 1e-24 }
 0x282   :  { %v1271_v37 = vpop.eup %1270  ;;  %v734_v10 = vpop.xlane.xlu0 %733 }
 0x283   :  { %895 = vst [vmem:[#allocation8 + $0x50] sm:$0xff] %v863_v32  ;;  %v864_v38 = vmax.f32 %v832_v33, 0.0  ;;  %v833_v39 = vmul.f32 %v1271_v37, %v1512_v23  ;;  %1284 = vrsqrt.f32 %v776_v36  ;;  %v777_v52 = vmax.f32 %v734_v10, 1e-24 }
 0x284   :  { %v1273_v48 = vpop.eup %1272  ;;  %v736_v17 = vpop.xlane.xlu1 %735 }
 0x285   :  { %896 = vst [vmem:[#allocation8 + $0x58] sm:$0xff] %v864_v38  ;;  %v865_v55 = vmax.f32 %v833_v39, 0.0  ;;  %v834_v42 = vmul.f32 %v1273_v48, %v1509_v22  ;;  %1286 = vrsqrt.f32 %v777_v52  ;;  %v778_v43 = vmax.f32 %v736_v17, 1e-24 }
 0x286   :  { %v1275_v44 = vpop.eup %1274  ;;  %v738_v16 = vpop.xlane.xlu0 %737 }
 0x287   :  { %897 = vst [vmem:[#allocation8 + $0x60] sm:$0xff] %v865_v55  ;;  %v866_v45 = vmax.f32 %v834_v42, 0.0  ;;  %v835_v49 = vmul.f32 %v1275_v44, %v1522_v29  ;;  %1288 = vrsqrt.f32 %v778_v43  ;;  %v779_v51 = vmax.f32 %v738_v16, 1e-24 }
 0x288   :  { %v1277_v57 = vpop.eup %1276  ;;  %v740_v23 = vpop.xlane.xlu1 %739 }
 0x289   :  { %898 = vst [vmem:[#allocation8 + $0x68] sm:$0xff] %v866_v45  ;;  %v867_v53 = vmax.f32 %v835_v49, 0.0  ;;  %v836_v54 = vmul.f32 %v1277_v57, %v1519_v28  ;;  %1290 = vrsqrt.f32 %v779_v51  ;;  %v780_v59 = vmax.f32 %v740_v23, 1e-24 }
 0x28a   :  { %v1279_v60 = vpop.eup %1278  ;;  %v742_v22 = vpop.xlane.xlu0 %741 }
 0x28b   :  { %899 = vst [vmem:[#allocation8 + $0x70] sm:$0xff] %v867_v53  ;;  %v868_v63 = vmax.f32 %v836_v54, 0.0  ;;  %v837_v61 = vmul.f32 %v1279_v60, %v1532_v35  ;;  %1292 = vrsqrt.f32 %v780_v59  ;;  %v781_v0 = vmax.f32 %v742_v22, 1e-24 }
 0x28c   :  { %v1281_v3 = vpop.eup %1280  ;;  %v744_v29 = vpop.xlane.xlu1 %743 }
 0x28d   :  { %900 = vst [vmem:[#allocation8 + $0x78] sm:$0xff] %v868_v63  ;;  %v869_v6 = vmax.f32 %v837_v61, 0.0  ;;  %v838_v62 = vmul.f32 %v1281_v3, %v1529_v34  ;;  %1294 = vrsqrt.f32 %v781_v0  ;;  %v782_v7 = vmax.f32 %v744_v29, 1e-24 }
 0x28e   :  { %v1283_v8 = vpop.eup %1282  ;;  %v746_v28 = vpop.xlane.xlu0 %745 }
 0x28f   :  { %901 = vst [vmem:[#allocation8 + $0x80] sm:$0xff] %v869_v6  ;;  %v870_v13 = vmax.f32 %v838_v62, 0.0  ;;  %v839_v14 = vmul.f32 %v1283_v8, %v1542_v41  ;;  %1296 = vrsqrt.f32 %v782_v7  ;;  %v783_v5 = vmax.f32 %v746_v28, 1e-24 }
 0x290   :  { %v1285_v15 = vpop.eup %1284  ;;  %v748_v35 = vpop.xlane.xlu1 %747 }
 0x291   :  { %902 = vst [vmem:[#allocation8 + $0x88] sm:$0xff] %v870_v13  ;;  %v871_v18 = vmax.f32 %v839_v14, 0.0  ;;  %v840_v21 = vmul.f32 %v1285_v15, %v1539_v40  ;;  %1298 = vrsqrt.f32 %v783_v5  ;;  %v784_v24 = vmax.f32 %v748_v35, 1e-24 }
 0x292   :  { %v1287_v4 = vpop.eup %1286  ;;  %v750_v34 = vpop.xlane.xlu0 %749 }
 0x293   :  { %903 = vst [vmem:[#allocation8 + $0x90] sm:$0xff] %v871_v18  ;;  %v872_v25 = vmax.f32 %v840_v21, 0.0  ;;  %v841_v26 = vmul.f32 %v1287_v4, %v1552_v47  ;;  %1300 = vrsqrt.f32 %v784_v24  ;;  %v785_v50 = vmax.f32 %v750_v34, 1e-24 }
 0x294   :  { %v1289_v31 = vpop.eup %1288  ;;  %v752_v41 = vpop.xlane.xlu1 %751 }
 0x295   :  { %904 = vst [vmem:[#allocation8 + $0x98] sm:$0xff] %v872_v25  ;;  %v873_v11 = vmax.f32 %v841_v26, 0.0  ;;  %v842_v32 = vmul.f32 %v1289_v31, %v1549_v46  ;;  %1302 = vrsqrt.f32 %v785_v50  ;;  %v786_v33 = vmax.f32 %v752_v41, 1e-24 }
 0x296   :  { %v1291_v36 = vpop.eup %1290  ;;  %v754_v40 = vpop.xlane.xlu0 %753 }
 0x297   :  { %905 = vst [vmem:[#allocation8 + $0xa0] sm:$0xff] %v873_v11  ;;  %v874_v37 = vmax.f32 %v842_v32, 0.0  ;;  %v843_v10 = vmul.f32 %v1291_v36, %v1562_v58  ;;  %1304 = vrsqrt.f32 %v786_v33  ;;  %v787_v38 = vmax.f32 %v754_v40, 1e-24 }
 0x298   :  { %v1293_v39 = vpop.eup %1292  ;;  %v756_v47 = vpop.xlane.xlu1 %755 }
 0x299   :  { %906 = vst [vmem:[#allocation8 + $0xa8] sm:$0xff] %v874_v37  ;;  %v875_v52 = vmax.f32 %v843_v10, 0.0  ;;  %v844_v48 = vmul.f32 %v1293_v39, %v1559_v56  ;;  %1306 = vrsqrt.f32 %v787_v38  ;;  %v788_v17 = vmax.f32 %v756_v47, 1e-24 }
 0x29a   :  { %v1295_v55 = vpop.eup %1294 }
 0x29b   :  { %907 = vst [vmem:[#allocation8 + $0xb0] sm:$0xff] %v875_v52  ;;  %v876_v46 = vmax.f32 %v844_v48, 0.0  ;;  %v845_v42 = vmul.f32 %v1295_v55, %v1572_v2  ;;  %1308 = vrsqrt.f32 %v788_v17 }
 0x29c   :  { %v1297_v43 = vpop.eup %1296 }
 0x29d   :  { %908 = vst [vmem:[#allocation8 + $0xb8] sm:$0xff] %v876_v46  ;;  %v877_v44 = vmax.f32 %v845_v42, 0.0  ;;  %v846_v58 = vmul.f32 %v1297_v43, %v1569_v1 }
 0x29e   :  { %v1299_v16 = vpop.eup %1298 }
 0x29f   :  { %909 = vst [vmem:[#allocation8 + $0xc0] sm:$0xff] %v877_v44  ;;  %v878_v45 = vmax.f32 %v846_v58, 0.0  ;;  %v847_v49 = vmul.f32 %v1299_v16, %v1582_v12 }
 0x2a0   :  { %v1301_v51 = vpop.eup %1300 }
 0x2a1   :  { %910 = vst [vmem:[#allocation8 + $0xc8] sm:$0xff] %v878_v45  ;;  %v879_v56 = vmax.f32 %v847_v49, 0.0  ;;  %v848_v57 = vmul.f32 %v1301_v51, %v1579_v9 }
 0x2a2   :  { %v1303_v23 = vpop.eup %1302 }
 0x2a3   :  { %911 = vst [vmem:[#allocation8 + $0xd0] sm:$0xff] %v879_v56  ;;  %v880_v53 = vmax.f32 %v848_v57, 0.0  ;;  %v849_v2 = vmul.f32 %v1303_v23, %v1592_v20 }
 0x2a4   :  { %v1305_v54 = vpop.eup %1304 }
 0x2a5   :  { %912 = vst [vmem:[#allocation8 + $0xd8] sm:$0xff] %v880_v53  ;;  %v881_v59 = vmax.f32 %v849_v2, 0.0  ;;  %v850_v1 = vmul.f32 %v1305_v54, %v1589_v19 }
 0x2a6   :  { %v1307_v60 = vpop.eup %1306 }
 0x2a7   :  { %913 = vst [vmem:[#allocation8 + $0xe0] sm:$0xff] %v881_v59  ;;  %v882_v22 = vmax.f32 %v850_v1, 0.0  ;;  %v851_v12 = vmul.f32 %v1307_v60, %v1602_v30 }
 0x2a8   :  { %v1309_v63 = vpop.eup %1308 }
 0x2a9   :  { %914 = vst [vmem:[#allocation8 + $0xe8] sm:$0xff] %v882_v22  ;;  %v883_v9 = vmax.f32 %v851_v12, 0.0  ;;  %v852_v61 = vmul.f32 %v1309_v63, %v1599_v27 }
 0x2ab   :  { %915 = vst [vmem:[#allocation8 + $0xf0] sm:$0xff] %v883_v9  ;;  %v884_v0 = vmax.f32 %v852_v61, 0.0 }
 0x2ad   :  { %916 = vst [vmem:[#allocation8 + $0xf8] sm:$0xff] %v884_v0 }
 0x2ae   :  { %1381 = shalt.err (!%p1378_p5)
}
 0x2af   :  { %928 = dma.vmem_to_hbm [thread:$0]  %s923_s5, 4096, %s1652_s4, [#allocation4], %s1398_s20, %s1398_s20, %s1399_s21  }
 0x2b0   :  { %1394 = dma.done.wait [#allocation4], 4096  }
 0x2b1   :  { %1395 = vsyncadd [#allocation4], 4294963200 }
 0x2b2   :  { %932 = vsyncpa [#allocation3], 1 }
 0x2b3   :  { %933 = vsyncpa [#allocation6], 1 }
 0x2b4   :  { %934 = vsyncpa [#allocation4], 1 }

</bundles_post_ra>
